<compile_context>
chip_gen: v7x
topology: tpu7x:2x2x1
jax: 0.10.0
libtpu: 0.0.40
codegen_flags: <defaults>
</compile_context>

<pallas_src>
import math
import functools

import jax
import jax.numpy as jnp
from jax.experimental import pallas as pl
from jax.experimental.pallas import tpu as pltpu

_LANE = 128
_SUBLANE = 8
_VMEM_LIMIT_BYTES = 32 * 1024 * 1024    # portable scoped-VMEM limit (v5e/v6e/v7x)
_BLOCK_VMEM_BUDGET = 20 * 1024 * 1024   # budget for double-buffered in/out blocks


def _bessel_kernel(r_ref, roots_ref, out_ref, *, inv_rmax, epsilon, prefactor):
    r = r_ref[...]                       # (1, tile) float32, edges on lanes
    roots = roots_ref[...]               # (B, 1) float32, basis on sublanes

    # Per-distance work stays on the small (1, tile) vector:
    r_scaled = r * inv_rmax                          # (1, tile)
    inv = prefactor / (r + epsilon)                  # (1, tile), exact divide
    # TODO(synk): pl.reciprocal(approx=True) would move the divide to the EUP
    # slot but costs ~1e-3 relative error; kept exact to match 1e-5 tolerance.

    # Only sin + one multiply run over the full (B, tile) broadcast tensor.
    out_ref[...] = jnp.sin(roots * r_scaled) * inv   # (B, tile), lane-dense


def _auto_tile(n_up: int, b: int) -> int:
    """Largest lane-tile whose double-buffered blocks fit the VMEM budget."""
    b_sub = pl.cdiv(b, _SUBLANE) * _SUBLANE          # out block sublane rows
    # bytes per lane of tile: 2 buffers * 4B * (out rows + r row padded to 8)
    per_lane = 2 * 4 * (b_sub + _SUBLANE)
    max_tile = max(_LANE, (_BLOCK_VMEM_BUDGET // per_lane) // _LANE * _LANE)
    return min(max_tile, n_up)


def bessel_basis_trainable(radial_distances: jax.Array,
                           bessel_roots: jax.Array,
                           rmax: float,
                           epsilon: float = 1e-5,
                           tile_n: int | None = None) -> jax.Array:
    """Pallas implementation of BesselBasisTrainable.forward.

    radial_distances: (N,) float32
    bessel_roots:     (B,) float32 (trainable parameter)
    returns:          (N, B) float32
    """
    n = radial_distances.shape[0]
    b = bessel_roots.shape[0]

    n_up = pl.cdiv(n, _LANE) * _LANE
    if tile_n is None:
        tile = _auto_tile(n_up, b)
    else:
        tile = max(_LANE, (int(tile_n) // _LANE) * _LANE)
        tile = min(tile, n_up)
    n_pad = pl.cdiv(n, tile) * tile
    num_steps = n_pad // tile

    r_row = radial_distances.astype(jnp.float32)
    if n_pad != n:
        # Zero padding is safe: sin(0) = 0, denominator = epsilon > 0.
        r_row = jnp.pad(r_row, (0, n_pad - n))
    r_row = r_row.reshape(1, n_pad)
    roots_col = bessel_roots.astype(jnp.float32).reshape(b, 1)

    kernel = functools.partial(
        _bessel_kernel,
        inv_rmax=float(1.0 / rmax),
        epsilon=float(epsilon),
        prefactor=float(2.0 / rmax))

    cost = pl.CostEstimate(
        flops=3 * n_pad * b,
        transcendentals=n_pad * b,
        bytes_accessed=4 * (n_pad + b + n_pad * b))

    out_t = pl.pallas_call(
        kernel,
        out_shape=jax.ShapeDtypeStruct((b, n_pad), jnp.float32),
        grid_spec=pltpu.PrefetchScalarGridSpec(
            num_scalar_prefetch=0,
            grid=(num_steps,),
            in_specs=[
                pl.BlockSpec((1, tile), lambda i: (0, i)),   # r tile (lane-dense)
                pl.BlockSpec((b, 1), lambda i: (0, 0)),      # roots (replicated)
            ],
            out_specs=pl.BlockSpec((b, tile), lambda i: (0, i)),
        ),
        compiler_params=pltpu.CompilerParams(
            dimension_semantics=("parallel",),
            vmem_limit_bytes=_VMEM_LIMIT_BYTES),
        cost_estimate=cost,
    )(r_row, roots_col)

    out = out_t.T            # (n_pad, B) — XLA fuses transpose + slice below
    if n_pad != n:
        out = out[:n]
    return out


def bessel_basis_ref(radial_distances, bessel_roots, rmax, epsilon=1e-5):
    prefactor = 2.0 / rmax
    r = radial_distances[..., None]
    numerator = jnp.sin(bessel_roots * r / rmax)
    return prefactor * (numerator / (r + epsilon))


if __name__ == "__main__":
    rmax = 5.0
    basis_size = 8
    epsilon = 1e-5

    # Deterministic parameter init, matching torch: arange(1, B+1) * pi
    bessel_roots = (jnp.arange(1, basis_size + 1, dtype=jnp.float32) * math.pi)

    key = jax.random.PRNGKey(0)

    # Case 1: small, non-multiple-of-128 edge count (padding + auto-tile clamp).
    n1 = 200
    r1 = jax.random.uniform(key, (n1,), dtype=jnp.float32, minval=0.1, maxval=rmax)
    out1 = jax.block_until_ready(bessel_basis_trainable(r1, bessel_roots, rmax, epsilon))
    ref1 = bessel_basis_ref(r1, bessel_roots, rmax, epsilon)
    assert out1.shape == (n1, basis_size)
    assert jnp.allclose(out1, ref1, rtol=1e-5, atol=1e-5), "mismatch vs reference (case 1)"

    # Case 2: forces a multi-step grid (tile_n=128 -> 8 grid steps).
    n2 = 1000
    r2 = jax.random.uniform(jax.random.PRNGKey(1), (n2,), dtype=jnp.float32,
                            minval=0.1, maxval=rmax)
    out2 = jax.block_until_ready(
        bessel_basis_trainable(r2, bessel_roots, rmax, epsilon, tile_n=128))
    ref2 = bessel_basis_ref(r2, bessel_roots, rmax, epsilon)
    assert out2.shape == (n2, basis_size)
    assert jnp.allclose(out2, ref2, rtol=1e-5, atol=1e-5), "mismatch vs reference (case 2)"

    # Case 3: auto-tiled path with padding at a moderate edge count.
    n3 = 4160
    r3 = jax.random.uniform(jax.random.PRNGKey(2), (n3,), dtype=jnp.float32,
                            minval=0.1, maxval=rmax)
    out3 = jax.block_until_ready(bessel_basis_trainable(r3, bessel_roots, rmax, epsilon))
    ref3 = bessel_basis_ref(r3, bessel_roots, rmax, epsilon)
    assert out3.shape == (n3, basis_size)
    assert jnp.allclose(out3, ref3, rtol=1e-5, atol=1e-5), "mismatch vs reference (case 3)"

    print("KERNEL_OK")
</pallas_src>

<mosaic_0001>
module attributes {stable_mosaic.version = 11 : i64} {
  func.func @_bessel_kernel(%arg0: i32, %arg1: memref<1x256xf32, #tpu.memory_space<vmem>>, %arg2: memref<8x1xf32, #tpu.memory_space<vmem>>, %arg3: memref<8x256xf32, #tpu.memory_space<vmem>>) attributes {dimension_semantics = [#tpu.dimension_semantics<parallel>], iteration_bounds = array<i64: 1>, scalar_prefetch = 0 : i64, scratch_operands = 0 : i64, tpu.core_type = #tpu.core_type<tc>, window_params = [{transform_indices = @transform_0, window_bounds = array<i64: 1, 256>}, {pipeline_mode = #tpu.pipeline_mode<synchronous>, transform_indices = @transform_1, window_bounds = array<i64: 8, 1>}, {transform_indices = @transform_2, window_bounds = array<i64: 8, 256>}]} {
    %c0 = arith.constant 0 : index
    %c0_0 = arith.constant 0 : index
    %0 = vector.load %arg1[%c0, %c0_0] : memref<1x256xf32, #tpu.memory_space<vmem>>, vector<1x256xf32>
    %c0_1 = arith.constant 0 : index
    %c0_2 = arith.constant 0 : index
    %1 = vector.load %arg2[%c0_1, %c0_2] : memref<8x1xf32, #tpu.memory_space<vmem>>, vector<8x1xf32>
    %cst = arith.constant 2.000000e-01 : f32
    %2 = vector.broadcast %cst : f32 to vector<1x256xf32>
    %3 = arith.mulf %0, %2 : vector<1x256xf32>
    %cst_3 = arith.constant 9.99999974E-6 : f32
    %4 = vector.broadcast %cst_3 : f32 to vector<1x256xf32>
    %5 = arith.addf %0, %4 : vector<1x256xf32>
    %cst_4 = arith.constant 4.000000e-01 : f32
    %6 = vector.broadcast %cst_4 : f32 to vector<1x256xf32>
    %7 = arith.divf %6, %5 : vector<1x256xf32>
    %8 = vector.broadcast %1 : vector<8x1xf32> to vector<8x256xf32>
    %9 = vector.broadcast %3 : vector<1x256xf32> to vector<8x256xf32>
    %10 = arith.mulf %8, %9 : vector<8x256xf32>
    %11 = math.sin %10 : vector<8x256xf32>
    %12 = vector.broadcast %7 : vector<1x256xf32> to vector<8x256xf32>
    %13 = arith.mulf %11, %12 : vector<8x256xf32>
    %c0_5 = arith.constant 0 : index
    %c0_6 = arith.constant 0 : index
    %14 = vector.load %arg3[%c0_5, %c0_6] : memref<8x256xf32, #tpu.memory_space<vmem>>, vector<8x256xf32>
    tpu.vector_store %arg3[%c0_5, %c0_6], %13 {strides = array<i32>} : memref<8x256xf32, #tpu.memory_space<vmem>>, vector<8x256xf32>,
    return
  }
  func.func @transform_0(%arg0: i32) -> (i32, i32) {
    %c0_i32 = arith.constant 0 : i32
    %c0_i32_0 = arith.constant 0 : i32
    return %c0_i32, %arg0 : i32, i32
  }
  func.func @transform_1(%arg0: i32) -> (i32, i32) {
    %c0_i32 = arith.constant 0 : i32
    %c0_i32_0 = arith.constant 0 : i32
    %c0_i32_1 = arith.constant 0 : i32
    return %c0_i32, %c0_i32_0 : i32, i32
  }
  func.func @transform_2(%arg0: i32) -> (i32, i32) {
    %c0_i32 = arith.constant 0 : i32
    %c0_i32_0 = arith.constant 0 : i32
    return %c0_i32, %arg0 : i32, i32
  }
}

</mosaic_0001>

<bundles_post_ra>
// kernel: tpu_custom_call.1
= control target key start
LH: loop header
LB: loop body
LE: loop exit
PB: predicated region body
PF: predicated region fallthrough
CT: control target
= control target key end

     0   :  { %v332_v1 = vmov 0   ;;  %s459_s0 = inlined_call_operand.vmem [shape: f32[1,256], index: 0, kind: input, shape index: {}]   ;;  %s460_s1 = inlined_call_operand.vmem [shape: f32[8,1], index: 1, kind: input, shape index: {}]   ;;  %s461_s2 = inlined_call_operand.hbm [shape: f32[8,256], index: 2, kind: output, shape index: {}]  }
   0x1   :  { %v13_v0 = vld [vmem:[%s460_s1] sm:$0xff]  ;;  %297 = vset.pattern.permute.xlu0 %v332_v1 }
   0x2   :  { %20 = vperm.xlu0 %297, %v13_v0  }
   0x3   :  { %7 = vsyncpa [#allocation3], 0  ;;  %v24_v2 = vlaneseq  ;;  %v363_v4 = vld [vmem:[%s459_s0] sm:$0x3]  ;;  %v333_v33 = vmov 683565275  }
   0x4   :  { %v14_v7 = vmul.f32 0.2, %v363_v4  ;;  %v334_v37 = vmov 2475754826   ;;  %v335_v39 = vmov 2131351028  }
   0x5   :  { %v358_v3 = vshrl.u32 %v24_v2, 7  ;;  %v336_v41 = vmov 2102212464   ;;  %v337_v43 = vmov 920167782   ;;  %s339_s0 = smov [#allocation2]  }
   0x6   :  { %v338_v50 = vmov 1326507024   ;;  %s265_s1 = sshll.u32 %s339_s0, 4  ;;  %s266_s1 = int_to_ptr.vmem [resolvable:$true] %s265_s1 }
   0x7   :  { %v26_v5 = vsub.s32 0, %v358_v3  ;;  %v30_v6 = vsub.s32 1, %v358_v3  ;;  %s308_s13 = scalar_lea.vmem %s266_s1, 256  ;;  %p313_p1 = scmp.lt.s32.totalorder %s266_s1, %s266_s1 }
   0x8   :  { %p309_p0 = scmp.ne.s32.totalorder %s266_s1, %s308_s13  ;;  %p314_p2 = scmp.lt.s32.totalorder %s308_s13, %s308_s13 }
   0x9   :  { %v27_v8 = vrot.slane %v14_v7, %v26_v5  ;;  %v31_v9 = vrot.slane %v14_v7, %v30_v6 }
   0xa   :  { %p315_p3 = por %p314_p2, %p313_p1 }
   0xc   :  { %p316_p4 = pnand %p315_p3, %p309_p0 }
  0x81   :  { %v21_v10 = vpop.permute.xlu0 %20 }
  0x82   :  { %v372_v11 = vmul.f32 %v27_v8, %v21_v10  ;;  %v374_v12 = vmul.f32 %v31_v9, %v21_v10 }
  0x84   :  { %v36_v13 = vand.u32 2147483647, %v372_v11  ;;  %v39_v14 = vand.u32 2139095040, %v372_v11  ;;  %v143_v15 = vand.u32 2139095040, %v374_v12  ;;  %v140_v18 = vand.u32 2147483647, %v374_v12 }
  0x85   :  { %vm38_vm14 = vcmp.lt.s32.totalorder %v372_v11, 0 }
  0x86   :  { %v40_v16 = vshrl.u32 %v39_v14, 23  ;;  %v43_v17 = vand.u32 8388607, %v36_v13  ;;  %v144_v19 = vshrl.u32 %v143_v15, 23  ;;  %v384_v24 = vand.u32 8388607, %v140_v18 }
  0x87   :  { %vm37_vm15 = vcmp.le.f32.partialorder %v36_v13, 0.7853982 }
  0x88   :  { %v273_v20 = vadd.s32 4294967169, %v40_v16  ;;  %v277_v21 = vadd.s32 4294967169, %v144_v19  ;;  %v44_v23 = vor.u32 8388608, %v43_v17  ;;  %v148_v31 = vor.u32 8388608, %v384_v24 }
  0x8a   :  { %v46_v22 = vadd.s32 1, %v273_v20  ;;  %v150_v25 = vadd.s32 1, %v277_v21  ;;  %v386_v30 = vshll.u32 %v44_v23, 8 }
  0x8c   :  { %vm47_vm0 = vcmp.gt.s32.totalorder %v46_v22, 0  ;;  %vm151_vm1 = vcmp.gt.s32.totalorder %v150_v25, 0 }
  0x8d   :  { %v48_v26 = vsel %vm47_vm0, %v46_v22, 0  ;;  %v152_v29 = vsel %vm151_vm1, %v150_v25, 0  ;;  %vm142_vm0 = vcmp.lt.s32.totalorder %v374_v12, 0  ;;  %vm432_vm1 = vcmp.le.f32.partialorder %v140_v18, 0.7853982 }
  0x8e   :  { %v49_v27 = vshrl.u32 %v48_v26, 5  ;;  %v50_v28 = vand.u32 31, %v48_v26  ;;  %v389_v35 = vshrl.u32 %v152_v29, 5  ;;  %v154_v36 = vand.u32 31, %v152_v29 }
  0x90   :  { %v51_v32 = vsub.s32 32, %v50_v28  ;;  %v53_v34 = vshll.u32 %v333_v33, %v50_v28  ;;  %v56_v38 = vshll.u32 %v334_v37, %v50_v28  ;;  %v59_v40 = vshll.u32 %v335_v39, %v50_v28 }
  0x91   :  { %v62_v42 = vshll.u32 %v336_v41, %v50_v28  ;;  %v65_v44 = vshll.u32 %v337_v43, %v50_v28  ;;  %vm68_vm2 = vcmp.lt.s32.totalorder %v49_v27, 1  ;;  %vm69_vm3 = vcmp.lt.s32.totalorder %v49_v27, 2 }
  0x92   :  { %v54_v45 = vshrl.u32 %v334_v37, %v51_v32  ;;  %v57_v46 = vshrl.u32 %v335_v39, %v51_v32  ;;  %v60_v47 = vshrl.u32 %v336_v41, %v51_v32  ;;  %v52_v48 = vshrl.u32 %v333_v33, %v51_v32 }
  0x93   :  { %v63_v49 = vshrl.u32 %v337_v43, %v51_v32  ;;  %v66_v51 = vshrl.u32 %v338_v50, %v51_v32  ;;  %v155_v55 = vsub.s32 32, %v154_v36  ;;  %vm70_vm4 = vcmp.lt.s32.totalorder %v49_v27, 3 }
  0x94   :  { %v55_v52 = vor.u32 %v54_v45, %v53_v34  ;;  %v58_v53 = vor.u32 %v57_v46, %v56_v38  ;;  %v61_v54 = vor.u32 %v60_v47, %v59_v40  ;;  %vm71_vm5 = vcmp.lt.s32.totalorder %v49_v27, 4 }
  0x95   :  { %v64_v56 = vor.u32 %v63_v49, %v62_v42  ;;  %v67_v57 = vor.u32 %v66_v51, %v65_v44  ;;  %v157_v1 = vshll.u32 %v333_v33, %v154_v36  ;;  %v158_v8 = vshrl.u32 %v334_v37, %v155_v55 }
  0x96   :  { %v72_v58 = vsel %vm68_vm2, %v52_v48, %v55_v52  ;;  %v73_v59 = vsel %vm71_vm5, %v61_v54, 2102212464  ;;  %v76_v60 = vsel %vm68_vm2, %v55_v52, %v58_v53  ;;  %v80_v61 = vsel %vm68_vm2, %v58_v53, %v61_v54 }
  0x97   :  { %v74_v62 = vsel %vm70_vm4, %v58_v53, %v73_v59  ;;  %v77_v63 = vsel %vm71_vm5, %v64_v56, 920167782  ;;  %v81_v0 = vsel %vm71_vm5, %v67_v57, 1326507024  ;;  %v160_v9 = vshll.u32 %v334_v37, %v154_v36 }
  0x98   :  { %v78_v2 = vsel %vm70_vm4, %v61_v54, %v77_v63  ;;  %v82_v7 = vsel %vm70_vm4, %v64_v56, %v81_v0  ;;  %v75_v10 = vsel %vm69_vm3, %v72_v58, %v74_v62  ;;  %v161_v16 = vshrl.u32 %v335_v39, %v155_v55 }
  0x99   :  { %v79_v14 = vsel %vm69_vm3, %v76_v60, %v78_v2  ;;  %v83_v15 = vsel %vm69_vm3, %v80_v61, %v82_v7  ;;  %v159_v22 = vor.u32 %v158_v8, %v157_v1  ;;  %v163_v24 = vshll.u32 %v335_v39, %v154_v36 }
  0x9a   :  { %v398_v17 = vmul.u32.u64.low %v386_v30, %v83_v15  ;;  %v399_v19 = vmul.u32.u64.high %v386_v30, %v83_v15, %v398_v17  ;;  %v402_v20 = vmul.u32.u64.low %v386_v30, %v79_v14  ;;  %v403_v21 = vmul.u32.u64.high %v386_v30, %v79_v14, %v402_v20 }
  0x9b   :  { %v162_v23 = vor.u32 %v161_v16, %v160_v9  ;;  %v164_v25 = vshrl.u32 %v336_v41, %v155_v55  ;;  %v166_v26 = vshll.u32 %v336_v41, %v154_v36  ;;  %v167_v28 = vshrl.u32 %v337_v43, %v155_v55 }
  0x9c   :  { %v170_v29 = vshrl.u32 %v338_v50, %v155_v55  ;;  %v188_v32 = vshll.u32 %v148_v31, 8  ;;  %v91_v27 = vmul.u32 %v386_v30, %v75_v10  ;;  %v156_v34 = vshrl.u32 %v333_v33, %v155_v55 }
  0x9d   :  { %v165_v37 = vor.u32 %v164_v25, %v163_v24  ;;  %v169_v38 = vshll.u32 %v337_v43, %v154_v36  ;;  %vm93_vm6 = vc.u32 %v399_v19, %v402_v20  ;;  %v94_v40 = vadd.s32 1, %v403_v21 }
  0x9e   :  { %v168_v42 = vor.u32 %v167_v28, %v166_v26  ;;  %vm172_vm7 = vcmp.lt.s32.totalorder %v389_v35, 1  ;;  %vm174_vm8 = vcmp.lt.s32.totalorder %v389_v35, 3  ;;  %vm175_vm9 = vcmp.lt.s32.totalorder %v389_v35, 4 }
  0x9f   :  { %v171_v44 = vor.u32 %v170_v29, %v169_v38  ;;  %v180_v39 = vsel %vm172_vm7, %v159_v22, %v162_v23  ;;  %v95_v31 = vsel %vm93_vm6, %v94_v40, %v403_v21  ;;  %v177_v41 = vsel %vm175_vm9, %v165_v37, 2102212464 }
  0xa0   :  { %v181_v30 = vsel %vm175_vm9, %v168_v42, 920167782  ;;  %v184_v33 = vsel %vm172_vm7, %v162_v23, %v165_v37  ;;  %v96_v45 = vadd.s32 %v95_v31, %v91_v27  ;;  %vm173_vm10 = vcmp.lt.s32.totalorder %v389_v35, 2 }
  0xa1   :  { %v182_v36 = vsel %vm174_vm8, %v165_v37, %v181_v30  ;;  %v185_v43 = vsel %vm175_vm9, %v171_v44, 1326507024  ;;  %v176_v46 = vsel %vm172_vm7, %v156_v34, %v159_v22  ;;  %v178_v47 = vsel %vm174_vm8, %v162_v23, %v177_v41 }
  0xa2   :  { %v183_v48 = vsel %vm173_vm10, %v180_v39, %v182_v36  ;;  %v186_v49 = vsel %vm174_vm8, %v168_v42, %v185_v43  ;;  %v97_v50 = vadd.s32 536870912, %v96_v45  ;;  %v179_v57 = vsel %vm173_vm10, %v176_v46, %v178_v47 }
  0xa3   :  { %v187_v51 = vsel %vm173_vm10, %v184_v33, %v186_v49  ;;  %v413_v52 = vmul.u32.u64.low %v188_v32, %v183_v48  ;;  %v414_v53 = vmul.u32.u64.high %v188_v32, %v183_v48, %v413_v52  ;;  %v195_v35 = vmul.u32 %v188_v32, %v179_v57 }
  0xa4   :  { %v416_v54 = vmul.u32.u64.low %v188_v32, %v187_v51  ;;  %v417_v55 = vmul.u32.u64.high %v188_v32, %v187_v51, %v416_v54  ;;  %v98_v56 = vshrl.u32 %v97_v50, 30  ;;  %v92_v16 = vadd.s32 %v402_v20, %v399_v19 }
  0xa5   :  { %v198_v59 = vadd.s32 1, %v414_v53  ;;  %v15_v34 = vadd.f32 1e-05, %v363_v4  ;;  %vm128_vm5 = vweird.f32 %v372_v11  ;;  %vm232_vm9 = vweird.f32 %v374_v12 }
  0xa6   :  { %v99_v58 = vshll.u32 %v98_v56, 30  ;;  %vm197_vm11 = vc.u32 %v417_v55, %v413_v52  ;;  %v196_v42 = vadd.s32 %v413_v52, %v417_v55  ;;  %v122_v39 = vsub.s32 4, %v98_v56 }
  0xa7   :  { %v199_v61 = vsel %vm197_vm11, %v198_v59, %v414_v53  ;;  %298 = vrcp.f32 %v15_v34 }
  0xa8   :  { %v100_v60 = vsub.s32 %v96_v45, %v99_v58  ;;  %v200_v62 = vadd.s32 %v199_v61, %v195_v35  ;;  %v123_v43 = vsel %vm38_vm14, %v122_v39, %v98_v56 }
  0xa9   :  { %v125_v50 = vsel %vm37_vm15, 0, %v123_v43 }
  0xaa   :  { %v102_v63 = vsub.s32 0, %v100_v60  ;;  %v201_v0 = vadd.s32 536870912, %v200_v62  ;;  %v129_v53 = vadd.s32 3, %v125_v50 }
  0xac   :  { %v274_v1 = vmin.u32 %v102_v63, %v100_v60  ;;  %v202_v2 = vshrl.u32 %v201_v0, 30  ;;  %v130_v59 = vand.u32 3, %v129_v53 }
  0xae   :  { %v104_v7 = vclz %v274_v1  ;;  %v203_v8 = vshll.u32 %v202_v2, 30  ;;  %v226_v52 = vsub.s32 4, %v202_v2  ;;  %vm135_vm2 = vcmp.eq.s32.totalorder %v130_v59, 2 }
  0xaf   :  { %vm132_vm3 = vcmp.eq.s32.totalorder %v130_v59, 0  ;;  %vm131_vm4 = vcmp.lt.s32.totalorder %v130_v59, 2 }
  0xb0   :  { %v275_v9 = vadd.s32 4294967294, %v104_v7  ;;  %v204_v10 = vsub.s32 %v200_v62, %v203_v8  ;;  %v227_v57 = vsel %vm142_vm0, %v226_v52, %v202_v2 }
  0xb1   :  { %v299_v55 = vpop.eup %298  ;;  %v229_v61 = vsel %vm432_vm1, 0, %v227_v57 }
  0xb2   :  { %vm276_vm12 = vcmp.lt.s32.totalorder %v275_v9, 0  ;;  %v206_v15 = vsub.s32 0, %v204_v10  ;;  %v17_v35 = vmul.f32 0.4, %v299_v55  ;;  %v233_v1 = vadd.s32 3, %v229_v61 }
  0xb3   :  { %v107_v14 = vsel %vm276_vm12, 0, %v275_v9 }
  0xb4   :  { %v108_v17 = vsub.s32 32, %v107_v14  ;;  %v112_v21 = vsub.s32 4294967266, %v107_v14  ;;  %v278_v22 = vmin.u32 %v206_v15, %v204_v10  ;;  %v109_v23 = vshll.u32 %v100_v60, %v107_v14 }
  0xb5   :  { %v248_v2 = vrot.slane %v17_v35, %v26_v5 }
  0xb6   :  { %v110_v24 = vshrl.u32 %v92_v16, %v108_v17  ;;  %v113_v25 = vadd.s32 127, %v112_v21  ;;  %v208_v26 = vclz %v278_v22 }
  0xb8   :  { %v111_v28 = vor.u32 %v110_v24, %v109_v23  ;;  %v114_v29 = vshll.u32 %v113_v25, 23  ;;  %v279_v32 = vadd.s32 4294967294, %v208_v26  ;;  %v252_v23 = vrot.slane %v17_v35, %v30_v6 }
  0xba   :  { %v115_v27 = vor.u32 4788187, %v114_v29  ;;  %vm280_vm13 = vcmp.lt.s32.totalorder %v279_v32, 0  ;;  %v118_v38 = vcvt.s32.f32 %v111_v28 }
  0xbb   :  { %v211_v40 = vsel %vm280_vm13, 0, %v279_v32 }
  0xbc   :  { %v116_v37 = vand.u32 2147483647, %v115_v27  ;;  %v212_v19 = vsub.s32 32, %v211_v40  ;;  %v216_v20 = vsub.s32 4294967266, %v211_v40  ;;  %v213_v31 = vshll.u32 %v204_v10, %v211_v40 }
  0xbd   :  { %v234_v10 = vand.u32 3, %v233_v1 }
  0xbe   :  { %v119_v44 = vmul.f32 %v118_v38, %v116_v37  ;;  %v214_v41 = vshrl.u32 %v196_v42, %v212_v19  ;;  %v217_v30 = vadd.s32 127, %v216_v20 }
  0xbf   :  { %vm239_vm6 = vcmp.eq.s32.totalorder %v234_v10, 2  ;;  %vm236_vm7 = vcmp.eq.s32.totalorder %v234_v10, 0  ;;  %vm235_vm8 = vcmp.lt.s32.totalorder %v234_v10, 2 }
  0xc0   :  { %v120_v33 = vxor.u32 2147483648, %v119_v44  ;;  %v215_v45 = vor.u32 %v214_v41, %v213_v31  ;;  %v218_v36 = vshll.u32 %v217_v30, 23 }
  0xc2   :  { %v121_v4 = vsel %vm38_vm14, %v120_v33, %v119_v44  ;;  %v219_v47 = vor.u32 4788187, %v218_v36  ;;  %v222_v49 = vcvt.s32.f32 %v215_v45 }
  0xc3   :  { %v124_v46 = vsel %vm37_vm15, %v372_v11, %v121_v4 }
  0xc4   :  { %300 = vcosq.f32 %v124_v46  ;;  %v220_v48 = vand.u32 2147483647, %v219_v47 }
  0xc5   :  { %302 = vsinq.f32 %v124_v46 }
  0xc6   :  { %v223_v51 = vmul.f32 %v222_v49, %v220_v48 }
  0xc8   :  { %v224_v54 = vxor.u32 2147483648, %v223_v51 }
  0xca   :  { %v225_v56 = vsel %vm142_vm0, %v224_v54, %v223_v51 }
  0xcb   :  { %v228_v58 = vsel %vm432_vm1, %v374_v12, %v225_v56 }
  0xcc   :  { %304 = vcosq.f32 %v228_v58 }
  0xcd   :  { %306 = vsinq.f32 %v228_v58 }
  0xce   :  { %v301_v60 = vpop.eup %300 }
  0xcf   :  { %v303_v62 = vpop.eup %302  ;;  %v136_v63 = vxor.u32 2147483648, %v301_v60 }
  0xd0   :  { %v133_v18 = vxor.u32 2147483648, %v303_v62 }
  0xd1   :  { %v137_v0 = vsel %vm135_vm2, %v136_v63, %v303_v62 }
  0xd2   :  { %v134_v7 = vsel %vm132_vm3, %v301_v60, %v133_v18 }
  0xd3   :  { %v138_v8 = vsel %vm131_vm4, %v134_v7, %v137_v0 }
  0xd4   :  { %v139_v9 = vsel %vm128_vm5, nan, %v138_v8 }
  0xd5   :  { %v255_v14 = vmul.f32 %v248_v2, %v139_v9 }
  0xd6   :  { %v305_v15 = vpop.eup %304 }
  0xd7   :  { %257 = vst [vmem:[#allocation2] sm:$0xff] %v255_v14  ;;  %v307_v16 = vpop.eup %306  ;;  %v240_v17 = vxor.u32 2147483648, %v305_v15 }
  0xd8   :  { %v237_v21 = vxor.u32 2147483648, %v307_v16 }
  0xd9   :  { %v241_v22 = vsel %vm239_vm6, %v240_v17, %v307_v16 }
  0xda   :  { %v238_v5 = vsel %vm236_vm7, %v305_v15, %v237_v21 }
  0xdb   :  { %v242_v11 = vsel %vm235_vm8, %v238_v5, %v241_v22 }
  0xdc   :  { %v243_v24 = vsel %vm232_vm9, nan, %v242_v11 }
  0xdd   :  { %v256_v25 = vmul.f32 %v252_v23, %v243_v24 }
  0xdf   :  { %258 = vst [vmem:[#allocation2 + $0x8] sm:$0xff] %v256_v25 }
  0xe0   :  { %319 = shalt.err (!%p316_p4)
}
  0xe1   :  { %s320_s16 = scalar_lea.hbm %s461_s2, 256 }
  0xe2   :  { %p321_p5 = scmp.ne.s32.totalorder %s461_s2, %s320_s16  ;;  %p324_p6 = scmp.lt.u32.totalorder %s320_s16, %s461_s2 }
  0xe4   :  { %p326_p7 = pnand %p324_p6, %p321_p5 }
  0xe6   :  { %329 = shalt.err (!%p326_p7)
}
  0xe7   :  { %268 = dma.vmem_to_hbm [thread:$0]  %s266_s1, 256, %s461_s2, [#allocation3]  }
  0xe8   :  { %330 = dma.done.wait [#allocation3], 256  }
  0xe9   :  { %331 = vsyncadd [#allocation3], 4294967040 }
  0xea   :  { %272 = vsyncpa [#allocation3], 1 }

</bundles_post_ra>
